<compile_context>
chip_gen: v7x
topology: tpu7x:2x2x1
jax: 0.10.0
libtpu: 0.0.40
codegen_flags: <defaults>
</compile_context>

<pallas_src>
import math

import jax
import jax.numpy as jnp
from jax.experimental import pallas as pl
from jax.experimental.pallas import tpu as pltpu


_VMEM_LIMIT = 32 * 1024 * 1024  # leaves headroom on v7x (64 MiB/TC); fine on v5e/v6e


def _round_up(x, m):
    return ((x + m - 1) // m) * m


# ----------------------------------------------------------------------------
# First (small-channel) layer: full im2col in JAX (cheap for Cx<=8 in absolute
# bytes), then one (M, K) @ (K, Op) MXU matmul per image with fused BN stats.
# ----------------------------------------------------------------------------
def conv2d_im2col_pallas(x_nhwc, w_oihw, pad, c_out_pad):
    N, H, W, Cx = x_nhwc.shape
    O, I, KH, KW = w_oihw.shape
    ph, pw = pad
    stride = 2
    OH = (H + 2 * ph - KH) // stride + 1
    OW = (W + 2 * pw - KW) // stride + 1
    M = OH * OW
    K = KH * KW * Cx
    Op = c_out_pad

    # Weights -> (K, Op) bf16, row order (ki, kj, c).
    wt = jnp.transpose(w_oihw, (2, 3, 1, 0)).astype(jnp.float32)   # (KH,KW,I,O)
    wt = jnp.pad(wt, ((0, 0), (0, 0), (0, Cx - I), (0, Op - O)))
    wt = wt.reshape(K, Op).astype(jnp.bfloat16)

    # Patches -> (N, M, K) bf16, same (ki, kj, c) ordering.
    xp = jnp.pad(x_nhwc.astype(jnp.bfloat16),
                 ((0, 0), (ph, ph), (pw, pw), (0, 0)))
    cols = []
    for ki in range(KH):
        for kj in range(KW):
            cols.append(xp[:, ki:ki + stride * OH:stride,
                           kj:kj + stride * OW:stride, :])
    patches = jnp.concatenate(cols, axis=-1).reshape(N, M, K)

    def kernel(p_ref, w_ref, y_ref, sum_ref, ssq_ref):
        acc = jnp.dot(p_ref[0], w_ref[...], preferred_element_type=jnp.float32)
        y_ref[0] = acc.astype(y_ref.dtype)              # single bf16 store
        sum_ref[0] = jnp.sum(acc, axis=0, keepdims=True)
        ssq_ref[0] = jnp.sum(acc * acc, axis=0, keepdims=True)

    y, s, q = pl.pallas_call(
        kernel,
        grid_spec=pltpu.PrefetchScalarGridSpec(
            num_scalar_prefetch=0,
            grid=(N,),
            in_specs=[
                pl.BlockSpec((1, M, K), lambda n: (n, 0, 0)),
                pl.BlockSpec((K, Op), lambda n: (0, 0)),
            ],
            out_specs=(
                pl.BlockSpec((1, M, Op), lambda n: (n, 0, 0)),
                pl.BlockSpec((1, 1, Op), lambda n: (n, 0, 0)),
                pl.BlockSpec((1, 1, Op), lambda n: (n, 0, 0)),
            ),
        ),
        out_shape=(
            jax.ShapeDtypeStruct((N, M, Op), jnp.bfloat16),
            jax.ShapeDtypeStruct((N, 1, Op), jnp.float32),
            jax.ShapeDtypeStruct((N, 1, Op), jnp.float32),
        ),
        compiler_params=pltpu.CompilerParams(
            dimension_semantics=("parallel",),
            vmem_limit_bytes=_VMEM_LIMIT,
        ),
    )(patches, wt)
    return y.reshape(N, OH, OW, Op), s, q, (OH, OW, OW)


# ----------------------------------------------------------------------------
# Strided conv (stride 2) for wide (128-padded) channel layers, as a per-image
# tap-accumulation kernel over a parity-repacked VMEM-resident slab.
#
# Output is "wide": WQ = OW + (KW-2)//2 columns per row; the extra wrap-around
# columns are masked out of the fused BN statistics (precomputed mask) and are
# dropped later inside the BN/ReLU kernel.
# ----------------------------------------------------------------------------
def conv2d_tap_pallas(x_nhwc, w_oihw, pad, c_out_pad):
    N, H, W, Cx = x_nhwc.shape
    O, I, KH, KW = w_oihw.shape
    ph, pw = pad
    stride = 2
    OH = (H + 2 * ph - KH) // stride + 1
    OW = (W + 2 * pw - KW) // stride + 1
    Hp, Wp = H + 2 * ph, W + 2 * pw
    assert Hp % 2 == 0 and Wp % 2 == 0
    HQ, WQ = Hp // 2, Wp // 2
    MW = OH * WQ                       # rows of the "wide" output per image
    qi_max, qj_max = (KH - 1) // 2, (KW - 1) // 2
    R = _round_up(qi_max * WQ + qj_max + MW, 8)   # padded slab rows
    Op = c_out_pad

    # Weights -> (KH*KW, Cx, Op) bf16, zero-padded on both channel dims.
    wt = jnp.transpose(w_oihw, (2, 3, 1, 0)).astype(jnp.float32)   # (KH,KW,I,O)
    wt = jnp.pad(wt, ((0, 0), (0, 0), (0, Cx - I), (0, Op - O)))
    wt = wt.reshape(KH * KW, Cx, Op).astype(jnp.bfloat16)

    # Input -> pad spatially, parity-split, flatten, pad rows, stack: (N,4,R,Cx).
    # TODO(synk): fuse this repack into the previous layer's BN kernel to save
    # one more HBM round-trip per layer boundary.
    xp = jnp.pad(x_nhwc.astype(jnp.bfloat16), ((0, 0), (ph, ph), (pw, pw), (0, 0)))
    parts = []
    for pi in range(2):
        for pj in range(2):
            sl = xp[:, pi::2, pj::2, :].reshape(N, HQ * WQ, Cx)
            parts.append(jnp.pad(sl, ((0, 0), (0, R - HQ * WQ), (0, 0))))
    xq = jnp.stack(parts, axis=1)

    # Static tap schedule: tap (ki,kj) -> (parity slab index, contiguous row offset).
    taps = []
    for ki in range(KH):
        for kj in range(KW):
            taps.append(((ki % 2) * 2 + (kj % 2), (ki // 2) * WQ + (kj // 2)))

    # Precomputed stats mask: 1.0 on valid output columns, 0.0 on wrap columns.
    mask = ((jnp.arange(MW, dtype=jnp.int32) % WQ) < OW)
    mask = mask.astype(jnp.float32).reshape(MW, 1)

    # TODO(synk): pack tap pairs (same parity) to K=256 matmuls on v6e/v7x.
    def kernel(xq_ref, w_ref, m_ref, y_ref, sum_ref, ssq_ref):
        # Value-level accumulation chain: no per-tap VMEM round-trips.
        acc = jnp.zeros((MW, Op), jnp.float32)
        for t, (p_idx, off) in enumerate(taps):
            lhs = xq_ref[0, p_idx, pl.ds(off, MW), :]
            acc = acc + jnp.dot(lhs, w_ref[t],
                                preferred_element_type=jnp.float32)
        y_ref[0] = acc.astype(y_ref.dtype)             # single bf16 store
        ym = acc * m_ref[...]                          # mask applied once
        sum_ref[0] = jnp.sum(ym, axis=0, keepdims=True)
        ssq_ref[0] = jnp.sum(ym * ym, axis=0, keepdims=True)

    y, s, q = pl.pallas_call(
        kernel,
        grid_spec=pltpu.PrefetchScalarGridSpec(
            num_scalar_prefetch=0,
            grid=(N,),
            in_specs=[
                pl.BlockSpec((1, 4, R, Cx), lambda n: (n, 0, 0, 0)),
                pl.BlockSpec((KH * KW, Cx, Op), lambda n: (0, 0, 0)),
                pl.BlockSpec((MW, 1), lambda n: (0, 0)),
            ],
            out_specs=(
                pl.BlockSpec((1, MW, Op), lambda n: (n, 0, 0)),
                pl.BlockSpec((1, 1, Op), lambda n: (n, 0, 0)),
                pl.BlockSpec((1, 1, Op), lambda n: (n, 0, 0)),
            ),
        ),
        out_shape=(
            jax.ShapeDtypeStruct((N, MW, Op), jnp.bfloat16),
            jax.ShapeDtypeStruct((N, 1, Op), jnp.float32),
            jax.ShapeDtypeStruct((N, 1, Op), jnp.float32),
        ),
        compiler_params=pltpu.CompilerParams(
            dimension_semantics=("parallel",),
            vmem_limit_bytes=_VMEM_LIMIT,
        ),
    )(xq, wt, mask)
    return y.reshape(N, OH, WQ, Op), s, q, (OH, OW, WQ)


# ----------------------------------------------------------------------------
# BatchNorm finalize (tiny JAX) + scale/shift + ReLU Pallas kernel.
# The kernel also drops the wrap-around columns (Win -> OW) so the output is
# directly the next layer's NHWC activation (bf16, lane-dense 128 channels).
# ----------------------------------------------------------------------------
def bn_finalize(sums, ssqs, gamma, beta, valid_count, Op):
    O = gamma.shape[0]
    gam = jnp.pad(gamma.astype(jnp.float32), (0, Op - O))
    bet = jnp.pad(beta.astype(jnp.float32), (0, Op - O))
    tot = jnp.sum(sums[:, 0, :], axis=0)
    tot2 = jnp.sum(ssqs[:, 0, :], axis=0)
    mean = tot / valid_count
    var = jnp.maximum(tot2 / valid_count - mean * mean, 0.0)   # biased batch var
    scale = gam * jax.lax.rsqrt(var + 1e-5)
    shift = bet - mean * scale
    return scale.reshape(1, Op), shift.reshape(1, Op)


def bn_relu_pallas(y4, scale, shift, ow):
    N, OH, Win, Op = y4.shape

    def kernel(y_ref, sc_ref, sh_ref, o_ref):
        v = y_ref[0, :, :ow, :].astype(jnp.float32)    # drop wrap columns on load
        o_ref[0] = jnp.maximum(v * sc_ref[...] + sh_ref[...],
                               0.0).astype(o_ref.dtype)

    out = pl.pallas_call(
        kernel,
        grid_spec=pltpu.PrefetchScalarGridSpec(
            num_scalar_prefetch=0,
            grid=(N,),
            in_specs=[
                pl.BlockSpec((1, OH, Win, Op), lambda n: (n, 0, 0, 0)),
                pl.BlockSpec((1, Op), lambda n: (0, 0)),
                pl.BlockSpec((1, Op), lambda n: (0, 0)),
            ],
            out_specs=pl.BlockSpec((1, OH, ow, Op), lambda n: (n, 0, 0, 0)),
        ),
        out_shape=jax.ShapeDtypeStruct((N, OH, ow, Op), jnp.bfloat16),
        compiler_params=pltpu.CompilerParams(
            dimension_semantics=("parallel",),
            vmem_limit_bytes=_VMEM_LIMIT,
        ),
    )(y4, scale, shift)
    return out


# ----------------------------------------------------------------------------
# Fused head: conv1 + conv2 (concatenated, 128-padded outputs) + bias +
# reparametrize, as one single-step matmul kernel (K fits VMEM trivially).
# ----------------------------------------------------------------------------
def head_pallas(x_last, w1, b1, w2, b2, eps, nz_pad=128):
    N, FH, FW, Cp = x_last.shape
    nz, c_last, KH, KW = w1.shape
    assert (FH, FW) == (KH, KW), "final conv must reduce spatial dims to 1x1"
    K = KH * KW * Cp
    NZP = nz_pad

    def prep_w(w):
        t = jnp.transpose(w, (2, 3, 1, 0)).astype(jnp.float32)   # (KH,KW,c_last,nz)
        t = jnp.pad(t, ((0, 0), (0, 0), (0, Cp - c_last), (0, NZP - nz)))
        return t.reshape(K, NZP)

    w_cat = jnp.concatenate([prep_w(w1), prep_w(w2)], axis=1).astype(jnp.bfloat16)
    b_cat = jnp.concatenate(
        [jnp.pad(b1.astype(jnp.float32), (0, NZP - nz)),
         jnp.pad(b2.astype(jnp.float32), (0, NZP - nz))]
    ).reshape(1, 2 * NZP)
    a = x_last.reshape(N, K).astype(jnp.bfloat16)
    eps_p = jnp.pad(eps.astype(jnp.float32), ((0, 0), (0, NZP - nz)))

    def kernel(a_ref, w_ref, b_ref, e_ref, z_ref, mu_ref, lv_ref):
        out = jnp.dot(a_ref[...], w_ref[...],
                      preferred_element_type=jnp.float32) + b_ref[...]
        mu = out[:, :NZP]
        lv = out[:, NZP:]
        mu_ref[...] = mu
        lv_ref[...] = lv
        z_ref[...] = mu + jnp.exp(lv * 0.5) * e_ref[...]

    z, mu, lv = pl.pallas_call(
        kernel,
        grid_spec=pltpu.PrefetchScalarGridSpec(
            num_scalar_prefetch=0,
            grid=(1,),
            in_specs=[
                pl.BlockSpec((N, K), lambda i: (0, 0)),
                pl.BlockSpec((K, 2 * NZP), lambda i: (0, 0)),
                pl.BlockSpec((1, 2 * NZP), lambda i: (0, 0)),
                pl.BlockSpec((N, NZP), lambda i: (0, 0)),
            ],
            out_specs=(
                pl.BlockSpec((N, NZP), lambda i: (0, 0)),
                pl.BlockSpec((N, NZP), lambda i: (0, 0)),
                pl.BlockSpec((N, NZP), lambda i: (0, 0)),
            ),
        ),
        out_shape=(
            jax.ShapeDtypeStruct((N, NZP), jnp.float32),
            jax.ShapeDtypeStruct((N, NZP), jnp.float32),
            jax.ShapeDtypeStruct((N, NZP), jnp.float32),
        ),
        compiler_params=pltpu.CompilerParams(
            dimension_semantics=("arbitrary",),
            vmem_limit_bytes=_VMEM_LIMIT,
        ),
    )(a, w_cat, b_cat, eps_p)
    return z[:, :nz], mu[:, :nz], lv[:, :nz]


# ----------------------------------------------------------------------------
# Encoder parameters + forward
# ----------------------------------------------------------------------------
def init_encoder_params(key, h, w, nz, nc, ngf):
    assert h % 16 == 0, "height has to be a multiple of 16"
    assert w % 16 == 0, "width has to be a multiple of 16"
    isize = h if h > w else w
    n = math.log2(isize)
    assert n == round(n), "imageSize must be a power of 2"
    n = int(n)
    kh, kw = int(4 / (w / h)), 4

    chans = [(nc, ngf)]
    for i in range(n - 3):
        chans.append((ngf * 2 ** i, ngf * 2 ** (i + 1)))

    keys = jax.random.split(key, 3 * len(chans) + 4)
    ki = 0
    main = []
    for (ci, co) in chans:
        wt = 0.05 * jax.random.normal(keys[ki], (co, ci, kh, kw), jnp.float32); ki += 1
        gamma = 1.0 + 0.1 * jax.random.normal(keys[ki], (co,), jnp.float32);    ki += 1
        beta = 0.05 * jax.random.normal(keys[ki], (co,), jnp.float32);          ki += 1
        main.append((wt, gamma, beta))

    c_last = ngf * 2 ** (n - 3)
    conv1_w = 0.05 * jax.random.normal(keys[ki], (nz, c_last, kh, kw), jnp.float32); ki += 1
    conv1_b = 0.05 * jax.random.normal(keys[ki], (nz,), jnp.float32);                ki += 1
    conv2_w = 0.05 * jax.random.normal(keys[ki], (nz, c_last, kh, kw), jnp.float32); ki += 1
    conv2_b = 0.05 * jax.random.normal(keys[ki], (nz,), jnp.float32);                ki += 1

    ph, pw = int(1 - (w != h)), 1
    return dict(main=main, conv1_w=conv1_w, conv1_b=conv1_b,
                conv2_w=conv2_w, conv2_b=conv2_b,
                kernel=(kh, kw), padding=(ph, pw))


def encoder_forward(x_nchw, params, eps):
    """Returns [z, mu, logvar] each in NCHW, shape (N, nz, 1, 1)."""
    ph, pw = params["padding"]
    x = jnp.transpose(x_nchw, (0, 2, 3, 1)).astype(jnp.float32)   # NHWC
    N = x.shape[0]

    # Pad the raw input channels only to a multiple of 8 (nc=3 -> 8): keeps the
    # first-layer HBM traffic small. Hidden / latent channels are 128-padded.
    c_in = x.shape[-1]
    x = jnp.pad(x, ((0, 0), (0, 0), (0, 0), (0, _round_up(c_in, 8) - c_in)))

    for (w_oihw, gamma, beta) in params["main"]:
        O = w_oihw.shape[0]
        Op = _round_up(O, 128)
        if x.shape[-1] <= 32:
            # Small-channel layer: single big matmul per image (K = KH*KW*Cxp).
            y4, s, q, (OH, OW, Win) = conv2d_im2col_pallas(x, w_oihw, (ph, pw), Op)
        else:
            y4, s, q, (OH, OW, Win) = conv2d_tap_pallas(x, w_oihw, (ph, pw), Op)
        scale, shift = bn_finalize(s, q, gamma, beta, float(N * OH * OW), Op)
        x = bn_relu_pallas(y4, scale, shift, OW)   # (N, OH, OW, Op) bf16

    nz = params["conv1_w"].shape[0]
    z_p, mu_p, lv_p = head_pallas(x, params["conv1_w"], params["conv1_b"],
                                  params["conv2_w"], params["conv2_b"],
                                  eps.reshape(N, nz))
    z = z_p.reshape(N, nz, 1, 1)
    mu = mu_p.reshape(N, nz, 1, 1)
    logvar = lv_p.reshape(N, nz, 1, 1)
    return [z, mu, logvar]


# ----------------------------------------------------------------------------
# Pure-JAX reference mirroring the kernel numerics (bf16 MXU inputs, f32
# accumulation, conv intermediates stored in bf16, BN/ReLU applied in f32).
# ----------------------------------------------------------------------------
def reference_forward(x_nchw, params, eps):
    ph, pw = params["padding"]
    x = jnp.transpose(x_nchw, (0, 2, 3, 1)).astype(jnp.float32)

    def conv(x, w_oihw, b, stride, pad):
        w = jnp.transpose(w_oihw, (2, 3, 1, 0)).astype(jnp.bfloat16)
        y = jax.lax.conv_general_dilated(
            x.astype(jnp.bfloat16), w, (stride, stride),
            [(pad[0], pad[0]), (pad[1], pad[1])],
            dimension_numbers=("NHWC", "HWIO", "NHWC"),
            preferred_element_type=jnp.float32)
        if b is not None:
            y = y + b.reshape(1, 1, 1, -1)
        return y

    for (w_oihw, gamma, beta) in params["main"]:
        y = conv(x, w_oihw, None, 2, (ph, pw))
        mean = jnp.mean(y, axis=(0, 1, 2), keepdims=True)
        var = jnp.mean((y - mean) ** 2, axis=(0, 1, 2), keepdims=True)
        yq = y.astype(jnp.bfloat16).astype(jnp.float32)   # mirror bf16 storage
        ybn = (yq - mean) * jax.lax.rsqrt(var + 1e-5) * gamma.reshape(1, 1, 1, -1) \
            + beta.reshape(1, 1, 1, -1)
        x = jnp.maximum(ybn, 0.0)

    mu = conv(x, params["conv1_w"], params["conv1_b"], 1, (0, 0))
    lv = conv(x, params["conv2_w"], params["conv2_b"], 1, (0, 0))
    mu = jnp.transpose(mu, (0, 3, 1, 2))   # (N, nz, 1, 1)
    lv = jnp.transpose(lv, (0, 3, 1, 2))
    z = mu + jnp.exp(lv * 0.5) * eps
    return [z, mu, lv]


# ----------------------------------------------------------------------------
if __name__ == "__main__":
    # h=w=16 (multiple of 16, power of 2), nc=3, ngf=8, nz=4, batch=2:
    # main = conv(3->8) + conv(8->16), spatial 16 -> 8 -> 4; head: 4x4 valid
    # conv -> (N, nz, 1, 1).
    H, W, NZ, NC, NGF, N = 16, 16, 4, 3, 8, 2

    root = jax.random.PRNGKey(0)
    k_params, k_x, k_eps = jax.random.split(root, 3)

    params = init_encoder_params(k_params, H, W, NZ, NC, NGF)
    x = jax.random.normal(k_x, (N, NC, H, W), jnp.float32)        # NCHW input
    eps = jax.random.normal(k_eps, (N, NZ, 1, 1), jnp.float32)    # reparam noise

    z, mu, logvar = encoder_forward(x, params, eps)
    jax.block_until_ready((z, mu, logvar))

    z_r, mu_r, lv_r = reference_forward(x, params, eps)
    assert z.shape == (N, NZ, 1, 1) and mu.shape == (N, NZ, 1, 1) and logvar.shape == (N, NZ, 1, 1)
    assert jnp.all(jnp.isfinite(z)) and jnp.all(jnp.isfinite(mu)) and jnp.all(jnp.isfinite(logvar))
    # bf16 MXU inputs + bf16 intermediates on both sides -> agreement inside 1e-2.
    assert jnp.allclose(mu, mu_r, rtol=1e-2, atol=1e-2)
    assert jnp.allclose(logvar, lv_r, rtol=1e-2, atol=1e-2)
    assert jnp.allclose(z, z_r, rtol=1e-2, atol=1e-2)

    print("KERNEL_OK")
</pallas_src>

<mosaic_0001>
module attributes {stable_mosaic.version = 11 : i64} {
  func.func @kernel(%arg0: i32, %arg1: memref<1x64x128xbf16, #tpu.memory_space<vmem>>, %arg2: memref<128x128xbf16, #tpu.memory_space<vmem>>, %arg3: memref<1x64x128xbf16, #tpu.memory_space<vmem>>, %arg4: memref<1x1x128xf32, #tpu.memory_space<vmem>>, %arg5: memref<1x1x128xf32, #tpu.memory_space<vmem>>) attributes {dimension_semantics = [#tpu.dimension_semantics<parallel>], iteration_bounds = array<i64: 2>, scalar_prefetch = 0 : i64, scratch_operands = 0 : i64, tpu.core_type = #tpu.core_type<tc>, window_params = [{transform_indices = @transform_0, window_bounds = array<i64: 1, 64, 128>}, {pipeline_mode = #tpu.pipeline_mode<synchronous>, transform_indices = @transform_1, window_bounds = array<i64: 128, 128>}, {transform_indices = @transform_2, window_bounds = array<i64: 1, 64, 128>}, {transform_indices = @transform_3, window_bounds = array<i64: 1, 1, 128>}, {transform_indices = @transform_4, window_bounds = array<i64: 1, 1, 128>}]} {
    %c0 = arith.constant 0 : index
    %c0_0 = arith.constant 0 : index
    %c0_1 = arith.constant 0 : index
    %0 = vector.load %arg1[%c0, %c0_0, %c0_1] : memref<1x64x128xbf16, #tpu.memory_space<vmem>>, vector<1x64x128xbf16>
    %1 = vector.shape_cast %0 : vector<1x64x128xbf16> to vector<64x128xbf16>
    %c0_2 = arith.constant 0 : index
    %c0_3 = arith.constant 0 : index
    %2 = vector.load %arg2[%c0_2, %c0_3] : memref<128x128xbf16, #tpu.memory_space<vmem>>, vector<128x128xbf16>
    %cst = arith.constant dense<0.000000e+00> : vector<64x128xf32>
    %3 = tpu.matmul %1, %2, %cst {dimension_numbers = #tpu.dot_dimension_numbers<[1], [0], [0], [1], [0, 0, 1, 1], [], []>} : vector<64x128xbf16>, vector<128x128xbf16>, vector<64x128xf32> -> vector<64x128xf32>
    %4 = arith.truncf %3 : vector<64x128xf32> to vector<64x128xbf16>
    %c0_4 = arith.constant 0 : index
    %c0_5 = arith.constant 0 : index
    %c0_6 = arith.constant 0 : index
    %5 = vector.load %arg3[%c0_4, %c0_5, %c0_6] : memref<1x64x128xbf16, #tpu.memory_space<vmem>>, vector<1x64x128xbf16>
    %6 = vector.shape_cast %5 : vector<1x64x128xbf16> to vector<64x128xbf16>
    %7 = vector.shape_cast %4 : vector<64x128xbf16> to vector<1x64x128xbf16>
    tpu.vector_store %arg3[%c0_4, %c0_5, %c0_6], %7 {strides = array<i32>} : memref<1x64x128xbf16, #tpu.memory_space<vmem>>, vector<1x64x128xbf16>,
    %cst_7 = arith.constant dense<0.000000e+00> : vector<128xf32>
    %8 = vector.multi_reduction <add>, %3, %cst_7 [0] : vector<64x128xf32> to vector<128xf32>
    %9 = vector.shape_cast %8 : vector<128xf32> to vector<1x128xf32>
    %c0_8 = arith.constant 0 : index
    %c0_9 = arith.constant 0 : index
    %c0_10 = arith.constant 0 : index
    %10 = vector.load %arg4[%c0_8, %c0_9, %c0_10] : memref<1x1x128xf32, #tpu.memory_space<vmem>>, vector<1x1x128xf32>
    %11 = vector.shape_cast %10 : vector<1x1x128xf32> to vector<1x128xf32>
    %12 = vector.shape_cast %9 : vector<1x128xf32> to vector<1x1x128xf32>
    tpu.vector_store %arg4[%c0_8, %c0_9, %c0_10], %12 {strides = array<i32>} : memref<1x1x128xf32, #tpu.memory_space<vmem>>, vector<1x1x128xf32>,
    %13 = arith.mulf %3, %3 : vector<64x128xf32>
    %cst_11 = arith.constant dense<0.000000e+00> : vector<128xf32>
    %14 = vector.multi_reduction <add>, %13, %cst_11 [0] : vector<64x128xf32> to vector<128xf32>
    %15 = vector.shape_cast %14 : vector<128xf32> to vector<1x128xf32>
    %c0_12 = arith.constant 0 : index
    %c0_13 = arith.constant 0 : index
    %c0_14 = arith.constant 0 : index
    %16 = vector.load %arg5[%c0_12, %c0_13, %c0_14] : memref<1x1x128xf32, #tpu.memory_space<vmem>>, vector<1x1x128xf32>
    %17 = vector.shape_cast %16 : vector<1x1x128xf32> to vector<1x128xf32>
    %18 = vector.shape_cast %15 : vector<1x128xf32> to vector<1x1x128xf32>
    tpu.vector_store %arg5[%c0_12, %c0_13, %c0_14], %18 {strides = array<i32>} : memref<1x1x128xf32, #tpu.memory_space<vmem>>, vector<1x1x128xf32>,
    return
  }
  func.func @transform_0(%arg0: i32) -> (i32, i32, i32) {
    %c0_i32 = arith.constant 0 : i32
    %c0_i32_0 = arith.constant 0 : i32
    %c0_i32_1 = arith.constant 0 : i32
    return %arg0, %c0_i32, %c0_i32_0 : i32, i32, i32
  }
  func.func @transform_1(%arg0: i32) -> (i32, i32) {
    %c0_i32 = arith.constant 0 : i32
    %c0_i32_0 = arith.constant 0 : i32
    %c0_i32_1 = arith.constant 0 : i32
    return %c0_i32, %c0_i32_0 : i32, i32
  }
  func.func @transform_2(%arg0: i32) -> (i32, i32, i32) {
    %c0_i32 = arith.constant 0 : i32
    %c0_i32_0 = arith.constant 0 : i32
    %c0_i32_1 = arith.constant 0 : i32
    return %arg0, %c0_i32, %c0_i32_0 : i32, i32, i32
  }
  func.func @transform_3(%arg0: i32) -> (i32, i32, i32) {
    %c0_i32 = arith.constant 0 : i32
    %c0_i32_0 = arith.constant 0 : i32
    %c0_i32_1 = arith.constant 0 : i32
    return %arg0, %c0_i32, %c0_i32_0 : i32, i32, i32
  }
  func.func @transform_4(%arg0: i32) -> (i32, i32, i32) {
    %c0_i32 = arith.constant 0 : i32
    %c0_i32_0 = arith.constant 0 : i32
    %c0_i32_1 = arith.constant 0 : i32
    return %arg0, %c0_i32, %c0_i32_0 : i32, i32, i32
  }
}

</mosaic_0001>

<bundles_post_ra>
// kernel: tpu_custom_call.1
= control target key start
LH: loop header
LB: loop body
LE: loop exit
PB: predicated region body
PF: predicated region fallthrough
CT: control target
= control target key end

     0   :  { %10 = vsyncpa [#allocation3], 0  ;;  %s1394_s0 = inlined_call_operand.hbm [shape: bf16[2,64,128], index: 0, kind: input, shape index: {}]   ;;  %s1395_s1 = inlined_call_operand.hbm [shape: bf16[128,128], index: 1, kind: input, shape index: {}]   ;;  %s1396_s2 = inlined_call_operand.hbm [shape: bf16[2,64,128], index: 2, kind: output, shape index: {0}]   ;;  %s1397_s3 = inlined_call_operand.hbm [shape: f32[2,1,128], index: 3, kind: output, shape index: {1}]   ;;  %s1398_s4 = inlined_call_operand.hbm [shape: f32[2,1,128], index: 4, kind: output, shape index: {2}]  }
   0x1   :  { %12 = vsyncpa [#allocation3 + $0x1], 0 }
   0x2   :  { %13 = vsyncpa [#allocation6], 0 }
   0x3   :  { %14 = vsyncpa [#allocation4], 0 }
   0x4   :  { %16 = vsyncpa [#allocation4 + $0x1], 0 }
   0x5   :  { %17 = vsyncpa [#allocation9], 0 }
   0x6   :  { %19 = vsyncpa [#allocation9 + $0x1], 0  ;;  %s1099_s15 = smov 0   ;;  %s1101_s16 = smov 0  }
   0x7   :  { %s1103_s17 = smov 0   ;;  %s1105_s18 = smov 0  }
   0x8 LB: > { %s1120_s19 = sadd.s32 4294967295, %s1063_s18   ;;  %s669_s20 = sadd.s32 4294967294, %s1063_s18   ;;  %s1063_s18 = sphi %s1105_s18, %s1418_s18   ;;  %s1059_s17 = sphi %s1103_s17, %s1417_s17   ;;  %s1055_s16 = sphi %s1101_s16, %s1416_s16   ;;  %s1051_s15 = sphi %s1099_s15, %s1415_s15  }
   0x9   : > { %p45_p0 = scmp.ne.s32.totalorder %s1055_s16, %s1051_s15  ;;  %p1399_p1 = scmp.eq.s32.totalorder %s1120_s19, 0 }
   0xa   : > { %p96_p3 = scmp.eq.s32.totalorder %s669_s20, 1  ;;  %p670_p5 = scmp.ge.s32.totalorder %s1063_s18, 1 }
   0xb   : > { %p1131_p4 = por %p1399_p1, %p45_p0  ;;  %p155_p7 = scmp.lt.s32.totalorder %s1063_s18, 3 }
   0xc   : > { %p1136_p6 = por %p96_p3, %p45_p0  ;;  %s1065_s24 = smov [#allocation5]  }
   0xd   : > { %s1402_s21 = scalar_select %p1131_p4, 1, 0 }
   0xe   : > { %s1403_s22 = scalar_select %p1136_p6, 1, 0 }
   0xf   : > { %p1141_p8 = pnand %p670_p5, %p155_p7  ;;  %s167_s25 = sshll.u32 %s1065_s24, 4  ;;  %s1145_s25 = int_to_ptr.vmem [resolvable:$true] %s167_s25 }
  0x10   : > { %s1157_s27 = sadd.s32 1, %s1063_s18   ;;  %s32_s28 = sadd.s32 1, %s1059_s17 }
  0x11   : > { %s1404_s23 = scalar_select %p1141_p8, 1, 0 }
  0x12   : > { %p804_p9 = pneg %p1141_p8  ;;  %s29_s29 = ssub.s32 %s1063_s18, %s1157_s27 }
  0x13   : > { %s875_s6 = scalar_lea.hbm %s1395_s1, 1024 }
  0x14   : > { %p1152_p11 = pnand %p804_p9, %p1399_p1  ;;  %p876_p12 = scmp.ne.s32.totalorder %s1395_s1, %s875_s6 }
  0x15   : > { %p882_p5 = scmp.lt.u32.totalorder %s875_s6, %s1395_s1 }
  0x16   : > { %p877_p13 = pneg %p1152_p11 }
  0x18   : > { %p878_p0 = pnand %p877_p13, %p876_p12 }
  0x1a   : > { %p879_p3 = pneg %p878_p0 }
  0x1c   : > { %p884_p7 = pnand %p882_p5, %p879_p3 }
  0x1e   : > { %887 = shalt.err (!%p884_p7)
}
  0x1f   : > { %s888_s11 = scalar_lea.vmem %s1145_s25, 1024  ;;  %p896_p2 = scmp.lt.s32.totalorder %s1145_s25, %s1145_s25 }
  0x20   : > { %p889_p9 = scmp.ne.s32.totalorder %s1145_s25, %s888_s11  ;;  %p897_p6 = scmp.lt.s32.totalorder %s888_s11, %s888_s11 }
  0x22   : > { %p891_p10 = pnand %p889_p9, %p877_p13  ;;  %p898_p4 = por %p897_p6, %p896_p2 }
  0x24   : > { %p892_p1 = pneg %p891_p10 }
  0x26   : > { %p899_p8 = pnand %p898_p4, %p892_p1 }
  0x28   : > { %902 = shalt.err (!%p899_p8)
}
  0x29   : > { %s1066_s12 = smov 64   ;;  %s1067_s13 = smov 4  }
  0x2a   : > { %807 = dma.hbm_to_vmem [thread:$0]  (!%p1152_p11), %s1395_s1, 1024, %s1145_s25, [#allocation6], %s1066_s12, %s1066_s12, %s1067_s13  }
  0x2b   : > { %p30_p1 = scmp.eq.s32.totalorder %s29_s29, 0  ;;  %p39_p2 = scmp.ne.s32.totalorder %s1059_s17, %s1055_s16 }
  0x2c   : > { %p40_p4 = scmp.eq.s32.totalorder %s1063_s18, 0  ;;  %p823_p6 = scmp.lt.s32.totalorder %s1063_s18, 2 }
  0x2d   : > { %s1191_s30 = scalar_select %p30_p1, %s1059_s17, %s32_s28  }
  0x2e   : > { %p41_p8 = por %p40_p4, %p39_p2  ;;  %p1406_p10 = scmp.eq.s32.totalorder %s1120_s19, 1 }
  0x2f   : > { %s181_s26 = sand.u32 1, %s1059_s17   ;;  %s707_s6 = sshll.u32 %s1063_s18, 9 }
  0x30   : > { %p1195_p12 = por %p1406_p10, %p39_p2  ;;  %s673_s7 = sshll.u32 %s181_s26, 5 }
  0x31   : > { %s1204_s10 = scalar_lea.hbm %s1394_s0, %s707_s6  ;;  %s185_s25 = scalar_lea.vmem [#allocation2], %s673_s7 }
  0x32   : > { %s192_s28 = sshll.u32 %s185_s25, 4  ;;  %p1206_p11 = pnand %p823_p6, %p41_p8  ;;  %s1210_s28 = int_to_ptr.vmem [resolvable:$true] %s192_s28 }
  0x33   : > { %s1212_s11 = scalar_lea.sflag [#allocation3], %s181_s26  ;;  %s903_s14 = scalar_lea.hbm %s1204_s10, 512 }
  0x34   : > { %p904_p13 = scmp.ne.s32.totalorder %s1204_s10, %s903_s14  ;;  %p905_p0 = pneg %p1206_p11 }
  0x35   : > { %s908_s7 = scalar_lea.hbm %s1394_s0, 1024  ;;  %p909_p7 = scmp.lt.u32.totalorder %s1204_s10, %s1394_s0 }
  0x36   : > { %p906_p3 = pnand %p905_p0, %p904_p13  ;;  %p910_p9 = scmp.lt.u32.totalorder %s908_s7, %s903_s14 }
  0x37   : > { %p912_p2 = scmp.lt.u32.totalorder %s903_s14, %s1204_s10 }
  0x38   : > { %p907_p5 = pneg %p906_p3  ;;  %p911_p1 = por %p910_p9, %p909_p7 }
  0x3a   : > { %p913_p4 = por %p912_p2, %p911_p1 }
  0x3c   : > { %p914_p6 = pnand %p913_p4, %p907_p5 }
  0x3e   : > { %917 = shalt.err (!%p914_p6)
}
  0x3f   : > { %s918_s26 = scalar_lea.vmem %s1210_s28, 512  ;;  %s1068_s25 = smov [#allocation2]  }
  0x40   : > { %p919_p8 = scmp.ne.s32.totalorder %s1210_s28, %s918_s26  ;;  %s923_s24 = sshll.u32 %s1068_s25, 4  ;;  %s924_s24 = int_to_ptr.vmem [resolvable:$false] %s923_s24 }
  0x41   : > { %s925_s6 = scalar_lea.vmem %s924_s24, 1024  ;;  %p926_p3 = scmp.lt.s32.totalorder %s1210_s28, %s924_s24 }
  0x42   : > { %p921_p10 = pnand %p919_p8, %p905_p0  ;;  %p927_p7 = scmp.lt.s32.totalorder %s925_s6, %s918_s26 }
  0x44   : > { %p922_p13 = pneg %p921_p10  ;;  %p928_p9 = por %p927_p7, %p926_p3 }
  0x46   : > { %p929_p1 = pnand %p928_p9, %p922_p13 }
  0x48   : > { %932 = shalt.err (!%p929_p1)
}
  0x49   : > { %811 = dma.hbm_to_vmem [thread:$0]  (!%p1206_p11), %s1204_s10, 512, %s1210_s28, %s1212_s11, %s1066_s12, %s1066_s12, %s1067_s13  }
  0x4a   : > { %p1409_p0 = scmp.ne.s32.totalorder %s1404_s23, 0 }
  0x4b   : > { %s1246_s14 = sand.u32 (!%p1409_p0), 1, %s1055_s16   ;;  %p1410_p5 = scmp.ne.s32.totalorder (!%p1409_p0), %s1402_s21, 0 }
  0x4c   : > { %204 = sbr.rel (%p1409_p0) target bundleno = 408 (0x198), region = 28  ;;  %s677_s7 = sshll.u32 (!%p1409_p0), %s1246_s14, 5 }
  0x4d   : > { %s207_s8 = scalar_lea.sflag (!%p1409_p0), [#allocation3], %s1246_s14  ;;  %s1252_s29 = scalar_lea.vmem (!%p1409_p0), [#allocation2], %s677_s7 }
  0x53   : > { %1034 = dma.done.wait (%p1410_p5), %s207_s8, 512  }
  0x54   : > { %1036 = vsyncadd (%p1410_p5), %s207_s8, 4294966784  ;;  %p1411_p11 = scmp.eq.s32.totalorder %s1120_s19, 0 }
  0x56   : > { %1038 = dma.done.wait (%p1411_p11), [#allocation6], 1024   ;;  %p1412_p2 = pmov %p1411_p11 }
  0x57   : > { %v863_v0 = vld [vmem:[#allocation5] sm:$0xff]   ;;  %v864_v1 = vld [vmem:[#allocation5 + $0x8] sm:$0xff]   ;;  %v865_v2 = vld [vmem:[#allocation5 + $0x10] sm:$0xff]   ;;  %s234_s21 = scalar_lea.vmem [#allocation7], %s677_s7  ;;  %s716_s12 = sshll.u32 %s1120_s19, 9 }
  0x58   : > { %1040 = vsyncadd (%p1412_p2), [#allocation6], 4294966272  ;;  %752 = vmatprep.subr.bf16.mxu0 %v863_v0  ;;  %776 = vmatprep.subr.bf16.mxu1 %v863_v0  ;;  %v866_v3 = vld [vmem:[#allocation5 + $0x18] sm:$0xff]   ;;  %v871_v4 = vld [vmem:[%s1252_s29] sm:$0xff]   ;;  %s507_s23 = sshll.u32 %s234_s21, 4  ;;  %s1277_s28 = scalar_lea.hbm %s1396_s2, %s716_s12  ;;  %s1271_s23 = int_to_ptr.vmem [resolvable:$true] %s507_s23 }
  0x59   : > { %753 = vmatpush3.bf16.msra.mxu0 %v863_v0  ;;  %784 = vmatpush3.bf16.msra.mxu1 %v863_v0  ;;  %v873_v5 = vld [vmem:[%s1252_s29 + $0x10] sm:$0xff]   ;;  %v867_v6 = vld [vmem:[#allocation5 + $0x20] sm:$0xff]   ;;  %v868_v7 = vld [vmem:[#allocation5 + $0x28] sm:$0xff]   ;;  %s486_s11 = scalar_lea.sflag [#allocation4], %s1246_s14  ;;  %s933_s9 = scalar_lea.vmem %s1271_s23, 512 }
  0x5a   : > { %754 = vmatprep.subr.bf16.mxu0 %v864_v1  ;;  %777 = vmatprep.subr.bf16.mxu1 %v864_v1  ;;  %v869_v8 = vld [vmem:[#allocation5 + $0x30] sm:$0xff]   ;;  %v870_v9 = vld [vmem:[#allocation5 + $0x38] sm:$0xff]   ;;  %v872_v10 = vld [vmem:[%s1252_s29 + $0x8] sm:$0xff]   ;;  %p934_p4 = scmp.ne.s32.totalorder %s1271_s23, %s933_s9  ;;  %s1069_s26 = smov [#allocation7]  }
  0x5b   : > { %768 = vmatprep.mubr.bf16.mxu0 %v871_v4  ;;  %772 = vmatprep.mubr.bf16.mxu1 %v873_v5  ;;  %v874_v11 = vld [vmem:[%s1252_s29 + $0x18] sm:$0xff]   ;;  %s937_s25 = sshll.u32 %s1069_s26, 4  ;;  %s938_s25 = int_to_ptr.vmem [resolvable:$false] %s937_s25 }
  0x5c   : > { %p935_p6 = pnand %p934_p4, %p1195_p12  ;;  %s939_s24 = scalar_lea.vmem %s938_s25, 1024 }
  0x5d   : > { %755 = vmatpush3.bf16.msra.mxu0 %v864_v1  ;;  %785 = vmatpush3.bf16.msra.mxu1 %v864_v1  ;;  %p940_p10 = scmp.lt.s32.totalorder %s1271_s23, %s938_s25  ;;  %p941_p13 = scmp.lt.s32.totalorder %s939_s24, %s933_s9 }
  0x5e   : > { %756 = vmatprep.subr.bf16.mxu0 %v865_v2  ;;  %778 = vmatprep.subr.bf16.mxu1 %v865_v2  ;;  %p936_p8 = pneg %p935_p6 }
  0x5f   : > { %p942_p3 = por %p941_p13, %p940_p10 }
  0x61   : > { %757 = vmatpush3.bf16.msra.mxu0 %v865_v2  ;;  %786 = vmatpush3.bf16.msra.mxu1 %v865_v2  ;;  %p943_p7 = pnand %p942_p3, %p936_p8 }
  0x62   : > { %758 = vmatprep.subr.bf16.mxu0 %v866_v3  ;;  %779 = vmatprep.subr.bf16.mxu1 %v866_v3 }
  0x65   : > { %759 = vmatpush3.bf16.msra.mxu0 %v866_v3  ;;  %787 = vmatpush3.bf16.msra.mxu1 %v866_v3 }
  0x66   : > { %760 = vmatprep.subr.bf16.mxu0 %v867_v6  ;;  %780 = vmatprep.subr.bf16.mxu1 %v867_v6 }
  0x69   : > { %761 = vmatpush3.bf16.msra.mxu0 %v867_v6  ;;  %788 = vmatpush3.bf16.msra.mxu1 %v867_v6 }
  0x6a   : > { %762 = vmatprep.subr.bf16.mxu0 %v868_v7  ;;  %781 = vmatprep.subr.bf16.mxu1 %v868_v7 }
  0x6d   : > { %763 = vmatpush3.bf16.msra.mxu0 %v868_v7  ;;  %789 = vmatpush3.bf16.msra.mxu1 %v868_v7 }
  0x6e   : > { %764 = vmatprep.subr.bf16.mxu0 %v869_v8  ;;  %782 = vmatprep.subr.bf16.mxu1 %v869_v8 }
  0x71   : > { %765 = vmatpush3.bf16.msra.mxu0 %v869_v8  ;;  %790 = vmatpush3.bf16.msra.mxu1 %v869_v8 }
  0x72   : > { %766 = vmatprep.subr.bf16.mxu0 %v870_v9  ;;  %783 = vmatprep.subr.bf16.mxu1 %v870_v9 }
  0x75   : > { %767 = vmatpush3.bf16.msra.mxu0 %v870_v9  ;;  %791 = vmatpush3.bf16.msra.mxu1 %v870_v9 }
  0x78   : > { %769 = vmatmul.mubr.bf16.vlgmr.msra.gmra.mrb[0].mxu0 %v872_v10  ;;  %773 = vmatmul.mubr.bf16.vlgmr.msra.gmra.mrb[0].mxu1 %v874_v11 }
 0x14b   : > { %v770_v12 = vpop.f32.mrb[0].mxu0  ;;  %v1268_v13 = vpop.f32.mrb[0].mxu1 }
 0x14c   : > { %v378_v14 = vpop.f32.mrb[1].mxu0  ;;  %v394_v15 = vpop.f32.mrb[1].mxu1  ;;  %v465_v27 = vmul.f32 %v770_v12, %v770_v12 }
 0x14d   : > { %v771_v16 = vpop.f32.mrb[2].mxu0  ;;  %v775_v17 = vpop.f32.mrb[2].mxu1  ;;  %v463_v18 = vmul.f32 %v378_v14, %v378_v14 }
 0x14e   : > { %v725_v19 = vpack.c.bf16 %v771_v16, %v770_v12  ;;  %v381_v20 = vpop.f32.mrb[3].mxu0  ;;  %v735_v21 = vpack.c.bf16 %v775_v17, %v1268_v13  ;;  %v397_v22 = vpop.f32.mrb[3].mxu1 }
 0x14f   : > { %v720_v23 = vpack.c.bf16 %v381_v20, %v378_v14  ;;  %v449_v24 = vadd.f32 %v381_v20, %v378_v14  ;;  %v464_v25 = vmul.f32 %v381_v20, %v381_v20  ;;  %v730_v26 = vpack.c.bf16 %v397_v22, %v394_v15 }
 0x150   : > { %737 = vst [vmem:[%s234_s21 + $0x8] sm:$0xff] %v725_v19   ;;  %739 = vst [vmem:[%s234_s21 + $0x18] sm:$0xff] %v735_v21  }
 0x151   : > { %721 = vst [vmem:[%s234_s21] sm:$0xff] %v720_v23   ;;  %v450_v28 = vadd.f32 %v770_v12, %v449_v24  ;;  %v471_v29 = vadd.f32 %v464_v25, %v463_v18  ;;  %738 = vst [vmem:[%s234_s21 + $0x10] sm:$0xff] %v730_v26  }
 0x152   : > { %946 = shalt.err (!%p943_p7)
}
 0x153   : > { %s947_s6 = scalar_lea.hbm %s1277_s28, 512  ;;  %s951_s29 = scalar_lea.hbm %s1396_s2, 1024 }
 0x154   : > { %p948_p9 = scmp.ne.s32.totalorder %s1277_s28, %s947_s6  ;;  %p952_p5 = scmp.lt.u32.totalorder %s1277_s28, %s1396_s2 }
 0x155   : > { %p953_p11 = scmp.lt.u32.totalorder %s951_s29, %s947_s6  ;;  %p955_p4 = scmp.lt.u32.totalorder %s947_s6, %s1277_s28 }
 0x156   : > { %p949_p1 = pnand %p948_p9, %p1195_p12 }
 0x157   : > { %p954_p2 = por %p953_p11, %p952_p5 }
 0x158   : > { %p950_p0 = pneg %p949_p1 }
 0x159   : > { %p956_p6 = por %p955_p4, %p954_p2 }
 0x15b   : > { %p957_p8 = pnand %p956_p6, %p950_p0 }
 0x15d   : > { %960 = shalt.err (!%p957_p8)
}
 0x15e   : > { %s1070_s13 = smov 64   ;;  %s1071_s10 = smov 4   ;;  %v466_v30 = vmul.f32 %v771_v16, %v771_v16  ;;  %v472_v31 = vadd.f32 %v471_v29, %v465_v27  ;;  %v451_v32 = vadd.f32 %v771_v16, %v450_v28  ;;  %v467_v33 = vmul.f32 %v394_v15, %v394_v15 }
 0x15f   : > { %798 = dma.vmem_to_hbm [thread:$0]  (%p1195_p12), %s1271_s23, 512, %s1277_s28, %s486_s11, %s1070_s13, %s1070_s13, %s1071_s10   ;;  %v468_v38 = vmul.f32 %v397_v22, %v397_v22  ;;  %v469_v39 = vmul.f32 %v1268_v13, %v1268_v13  ;;  %v470_v42 = vmul.f32 %v775_v17, %v775_v17 }
 0x160   : > { %v452_v34 = vadd.f32 %v451_v32, %v394_v15  ;;  %v473_v35 = vadd.f32 %v472_v31, %v466_v30  ;;  %s490_s23 = sand.u32 1, %s1120_s19   ;;  %s703_s28 = sshll.u32 %s1120_s19, 4 }
 0x161   : > { %s240_s11 = scalar_lea.vmem [#allocation8], %s1246_s14  ;;  %s246_s26 = scalar_lea.vmem [#allocation10], %s1246_s14 }
 0x162   : > { %v474_v36 = vadd.f32 %v473_v35, %v467_v33  ;;  %v453_v37 = vadd.f32 %v452_v34, %v397_v22  ;;  %s523_s9 = sshll.u32 %s240_s11, 4  ;;  %s536_s25 = sshll.u32 %s246_s26, 4  ;;  %s1317_s9 = int_to_ptr.vmem [resolvable:$true] %s523_s9  ;;  %s1324_s25 = int_to_ptr.vmem [resolvable:$true] %s536_s25 }
 0x163   : > { %s1315_s7 = scalar_lea.hbm %s1397_s3, %s703_s28  ;;  %s1322_s29 = scalar_lea.hbm %s1398_s4, %s703_s28 }
 0x164   : > { %v454_v40 = vadd.f32 %v1268_v13, %v453_v37  ;;  %v475_v41 = vadd.f32 %v474_v36, %v468_v38  ;;  %s1326_s21 = scalar_lea.sflag [#allocation9], %s490_s23  ;;  %s961_s12 = scalar_lea.vmem %s1317_s9, 16 }
 0x165   : > { %p962_p10 = scmp.ne.s32.totalorder %s1317_s9, %s961_s12  ;;  %s1072_s13 = smov [#allocation8]  }
 0x166   : > { %v455_v43 = vadd.f32 %v775_v17, %v454_v40  ;;  %v476_v44 = vadd.f32 %v475_v41, %v469_v39  ;;  %s965_s10 = sshll.u32 %s1072_s13, 4  ;;  %s966_s10 = int_to_ptr.vmem [resolvable:$false] %s965_s10 }
 0x167   : > { %p963_p13 = pnand %p962_p10, %p1195_p12  ;;  %s967_s24 = scalar_lea.vmem %s966_s10, 32 }
 0x168   : > { %v456_v45 = vrot.slane %v455_v43, 4  ;;  %v477_v46 = vadd.f32 %v476_v44, %v470_v42  ;;  %p968_p7 = scmp.lt.s32.totalorder %s1317_s9, %s966_s10  ;;  %p969_p9 = scmp.lt.s32.totalorder %s967_s24, %s961_s12 }
 0x169   : > { %p964_p3 = pneg %p963_p13 }
 0x16a   : > { %v457_v47 = vadd.f32 %v456_v45, %v455_v43  ;;  %v478_v48 = vrot.slane %v477_v46, 4  ;;  %p970_p1 = por %p969_p9, %p968_p7 }
 0x16c   : > { %v458_v49 = vrot.slane %v457_v47, 2  ;;  %v479_v50 = vadd.f32 %v478_v48, %v477_v46  ;;  %p971_p0 = pnand %p970_p1, %p964_p3 }
 0x16e   : > { %v459_v51 = vadd.f32 %v458_v49, %v457_v47  ;;  %v480_v52 = vrot.slane %v479_v50, 2 }
 0x170   : > { %v460_v53 = vrot.slane %v459_v51, 1  ;;  %v481_v54 = vadd.f32 %v480_v52, %v479_v50 }
 0x172   : > { %v482_v55 = vrot.slane %v481_v54, 1  ;;  %v461_v56 = vadd.f32 %v460_v53, %v459_v51 }
 0x174   : > { %462 = vst [vmem:[%s240_s11] sm:$0x1] %v461_v56  ;;  %v483_v57 = vadd.f32 %v482_v55, %v481_v54 }
 0x175   : > { %974 = shalt.err (!%p971_p0)
}
 0x176   : > { %s975_s23 = scalar_lea.hbm %s1315_s7, 16  ;;  %s979_s6 = scalar_lea.hbm %s1397_s3, 32 }
 0x177   : > { %p976_p5 = scmp.ne.s32.totalorder %s1315_s7, %s975_s23  ;;  %p980_p4 = scmp.lt.u32.totalorder %s1315_s7, %s1397_s3 }
 0x178   : > { %p981_p6 = scmp.lt.u32.totalorder %s979_s6, %s975_s23  ;;  %p983_p10 = scmp.lt.u32.totalorder %s975_s23, %s1315_s7 }
 0x179   : > { %p977_p11 = pnand %p976_p5, %p1195_p12 }
 0x17a   : > { %p982_p8 = por %p981_p6, %p980_p4 }
 0x17b   : > { %p978_p2 = pneg %p977_p11 }
 0x17c   : > { %p984_p13 = por %p983_p10, %p982_p8 }
 0x17e   : > { %p985_p3 = pnand %p984_p13, %p978_p2 }
 0x180   : > { %988 = shalt.err (!%p985_p3)
}
 0x181   : > { %799 = dma.vmem_to_hbm [thread:$0]  (%p1195_p12), %s1317_s9, 16, %s1315_s7, %s1326_s21   ;;  %484 = vst [vmem:[%s246_s26] sm:$0x1] %v483_v57 }
 0x182   : > { %s989_s12 = scalar_lea.vmem %s1324_s25, 16  ;;  %s1073_s13 = smov [#allocation10]  }
 0x183   : > { %p990_p7 = scmp.ne.s32.totalorder %s1324_s25, %s989_s12  ;;  %s993_s10 = sshll.u32 %s1073_s13, 4  ;;  %s994_s10 = int_to_ptr.vmem [resolvable:$false] %s993_s10 }
 0x184   : > { %s995_s24 = scalar_lea.vmem %s994_s10, 32  ;;  %p996_p0 = scmp.lt.s32.totalorder %s1324_s25, %s994_s10 }
 0x185   : > { %p991_p9 = pnand %p990_p7, %p1195_p12  ;;  %p997_p5 = scmp.lt.s32.totalorder %s995_s24, %s989_s12 }
 0x187   : > { %p992_p1 = pneg %p991_p9  ;;  %p998_p11 = por %p997_p5, %p996_p0 }
 0x189   : > { %p999_p2 = pnand %p998_p11, %p992_p1 }
 0x18b   : > { %1002 = shalt.err (!%p999_p2)
}
 0x18c   : > { %s1003_s14 = scalar_lea.hbm %s1322_s29, 16  ;;  %s1007_s7 = scalar_lea.hbm %s1398_s4, 32 }
 0x18d   : > { %p1004_p4 = scmp.ne.s32.totalorder %s1322_s29, %s1003_s14  ;;  %p1008_p10 = scmp.lt.u32.totalorder %s1322_s29, %s1398_s4 }
 0x18e   : > { %p1009_p13 = scmp.lt.u32.totalorder %s1007_s7, %s1003_s14  ;;  %p1011_p7 = scmp.lt.u32.totalorder %s1003_s14, %s1322_s29 }
 0x18f   : > { %p1005_p6 = pnand %p1004_p4, %p1195_p12 }
 0x190   : > { %p1010_p3 = por %p1009_p13, %p1008_p10 }
 0x191   : > { %p1006_p8 = pneg %p1005_p6 }
 0x192   : > { %p1012_p9 = por %p1011_p7, %p1010_p3 }
 0x194   : > { %p1013_p1 = pnand %p1012_p9, %p1006_p8 }
 0x196   : > { %1016 = shalt.err (!%p1013_p1)
}
 0x197   : > { %800 = dma.vmem_to_hbm [thread:$0]  (%p1195_p12), %s1324_s25, 16, %s1322_s29, %s1326_s21  }
 0x198 PF: > { %s548_s11 = sand.u32 1, %s1051_s15   ;;  %p1413_p0 = scmp.ne.s32.totalorder %s1403_s22, 0 }
 0x199   : > { %p1414_p5 = scmp.ge.s32.totalorder %s1063_s18, 2  ;;  %s549_s6 = scalar_lea.sflag [#allocation4], %s548_s11 }
 0x19b   : > { %p813_p11 = pnand %p1414_p5, %p1413_p0 }
 0x19d   : > { %1042 = dma.done.wait (!%p813_p11), %s549_s6, 512  }
 0x19e   : > { %1044 = vsyncadd (!%p813_p11), %s549_s6, 4294966784  ;;  %s557_s19 = sand.u32 1, %s669_s20  }
 0x19f   : > { %s558_s8 = scalar_lea.sflag [#allocation9], %s557_s19 }
 0x1a0   : > { %1046 = dma.done.wait (!%p813_p11), %s558_s8, 32  }
 0x1a1   : > { %1048 = vsyncadd (!%p813_p11), %s558_s8, 4294967264  ;;  %p22_p12 = scmp.ge.s32.totalorder %s1157_s27, 4   ;;  %s1415_s15 = smov %s1055_s16 }
 0x1a2   : > { %s1416_s16 = smov %s1059_s17  ;;  %s1417_s17 = smov %s1191_s30 }
 0x1a3   : > { %s1418_s18 = smov %s1157_s27  ;;  %24 = sbr.rel (!%p22_p12) target bundleno = 8 (0x8), region = 109 }
 0x1aa   :  { %570 = vsyncpa [#allocation3], 1 }
 0x1ab   :  { %572 = vsyncpa [#allocation3 + $0x1], 1 }
 0x1ac   :  { %573 = vsyncpa [#allocation6], 1 }
 0x1ad   :  { %574 = vsyncpa [#allocation4], 1 }
 0x1ae   :  { %576 = vsyncpa [#allocation4 + $0x1], 1 }
 0x1af   :  { %577 = vsyncpa [#allocation9], 1 }
 0x1b0   :  { %579 = vsyncpa [#allocation9 + $0x1], 1 }

</bundles_post_ra>
